<compile_context>
chip_gen: v6e
topology: v6e:2x2x1
jax: 0.10.0
libtpu: 0.0.40
codegen_flags: <defaults>
</compile_context>

<pallas_src>
import jax
import jax.numpy as jnp
from jax.experimental import pallas as pl
from jax.experimental.pallas import tpu as pltpu


def memory_module_kernel(facts_ref, aux_ref, wslab_ref, bslab_ref, out_ref):
    S, B, H = facts_ref.shape
    facts = facts_ref[...]                       # (S, B, H)
    aux = aux_ref[...]                           # (3, B, H): [question, prevM, eye_B]
    q = aux[0]                                   # (B, H)  questions.squeeze(0)
    m = aux[1]                                   # (B, H)  prevM.squeeze(0)
    eye_b = aux[2, :, 0:B]                       # (B, B)  host-built identity
    bias = bslab_ref[...]                        # (4, H): [b1, b+ub, bm, W2 row]
    b1, bcat, bm, w2row = bias[0:1, :], bias[1:2, :], bias[2:3, :], bias[3:4, :]

    # ---------------- cal_attention ----------------
    # z = cat([f*q, f*m, |f-q|, |f-m|], -1): (S, B, 4H); 4H = 128 -> lane-dense.
    z = jnp.concatenate(
        [facts * q, facts * m, jnp.abs(facts - q), jnp.abs(facts - m)], axis=-1)
    z = z.reshape(S * B, 4 * H)                  # leading-dim collapse (layout-free)
    g = jnp.tanh(jnp.dot(z, wslab_ref[0:4 * H, :],
                         preferred_element_type=jnp.float32) + b1)      # (S*B, H)

    # W2 (out_features = 1) as a lane reduction; b2 dropped (softmax shift-invariance).
    scores = jnp.sum(g.reshape(S, B, H) * w2row, axis=-1)               # (S, B)

    # F.softmax with no dim on a 2-D tensor -> dim=1 (batch axis), exactly as the
    # reference module behaves (PyTorch implicit-dim rule).
    scores = scores - jnp.max(scores, axis=1, keepdims=True)
    e = jnp.exp(scores)
    gates = e / jnp.sum(e, axis=1, keepdims=True)                       # (S, B)

    # (S, B) -> (B, S): identity @ gates^T (A.B^T contraction, no relayout needed).
    gates_bs = jnp.einsum("bk,sk->bs", eye_b, gates,
                          preferred_element_type=jnp.float32)           # (B, S)

    # ---------------- AttentionGRU recurrence ----------------
    # Fact projections are hidden-state independent -> hoisted off the serial chain as
    # one matmul with both GRU biases folded in (bcat = b + ub).
    fw = jnp.dot(facts.reshape(S * B, H), wslab_ref[4 * H:5 * H, :],
                 preferred_element_type=jnp.float32) + bcat             # (S*B, H)

    # Episode-independent half of the memory update, fused into one matmul:
    # [prevM | question] (B, 2H) @ Wm rows [0:H ; 2H:3H] (pre-stacked host-side).
    mq = jnp.concatenate([m, q], axis=-1)                               # (B, 2H)
    static_m = jnp.dot(mq, wslab_ref[6 * H:8 * H, :],
                       preferred_element_type=jnp.float32) + bm         # (B, H)

    # NOTE: the reference cell also computes sigmoid(Wr.fact + Ur.hidden) but never
    # uses it (dead code) -> omitted; Wr/Ur are not kernel inputs.
    u = wslab_ref[5 * H:6 * H, :]                # recurrent weight, loaded once
    hidden = jnp.zeros((B, H), jnp.float32)
    for sid in range(S):                         # S small & static -> fully unrolled
        h_hat = jnp.tanh(fw[sid * B:(sid + 1) * B, :]
                         + jnp.dot(hidden, u, preferred_element_type=jnp.float32))
        gate = gates_bs[:, sid:sid + 1]          # (B, 1), broadcasts over H lanes
        hidden = hidden + gate * (h_hat - hidden)

    # ---------------- memory update ----------------
    # nextM = relu([prevM ; episode ; question] @ Wm + bm)
    nextm = static_m + jnp.dot(hidden, wslab_ref[8 * H:9 * H, :],
                               preferred_element_type=jnp.float32)
    out_ref[...] = jnp.maximum(nextm, 0.0).astype(out_ref.dtype)


def pack_params(params):
    """Pack the module's parameters into two slabs (done once, host-side)."""
    H = params["U"].shape[0]
    wslab = jnp.concatenate([
        params["W1"],                   # rows [0, 4H)   attention scoring MLP
        params["W"],                    # rows [4H, 5H)  GRU fact weight
        params["U"],                    # rows [5H, 6H)  GRU recurrent weight
        params["Wm"][0:H, :],           # rows [6H, 7H)  memory_weight, prevM rows
        params["Wm"][2 * H:3 * H, :],   # rows [7H, 8H)  memory_weight, question rows
        params["Wm"][H:2 * H, :],       # rows [8H, 9H)  memory_weight, episode rows
    ], axis=0).astype(jnp.float32)                                      # (9H, H)
    bslab = jnp.concatenate([
        params["b1"],                   # row 0
        params["b"] + params["ub"],     # row 1: fused GRU bias
        params["bm"],                   # row 2
        params["W2"].reshape(1, H),     # row 3: W2 as a row (out_features = 1)
    ], axis=0).astype(jnp.float32)                                      # (4, H)
    return {"wslab": wslab, "bslab": bslab}


@jax.jit
def memory_module(facts, questions, prevM, packed):
    """facts: (S,B,H); questions, prevM: (1,B,H). Returns nextM: (1,B,H)."""
    S, B, H = facts.shape
    # aux row 2 carries a (B,B) identity (zero-padded to H lanes) used in-kernel for
    # the tiny gate transpose -- it rides in the same DMA as question / prevM.
    eye_pad = jnp.pad(jnp.eye(B, dtype=jnp.float32), ((0, 0), (0, H - B)))
    aux = jnp.stack([questions.reshape(B, H), prevM.reshape(B, H), eye_pad])  # (3,B,H)

    vmem = pl.BlockSpec(memory_space=pltpu.MemorySpace.VMEM)
    nextm = pl.pallas_call(
        memory_module_kernel,
        out_shape=jax.ShapeDtypeStruct((B, H), jnp.float32),
        in_specs=[vmem] * 4,
        out_specs=vmem,
    )(facts, aux, packed["wslab"], packed["bslab"])
    return nextm[None]                            # (1, B, H), like nextM.unsqueeze(0)


def init_params(key, hidden_size):
    """Xavier-normal weights (like init.xavier_normal), PyTorch-default biases.
    Weights stored transposed as (in_features, out_features)."""
    H = hidden_size

    def xavier(k, fan_in, fan_out):
        std = (2.0 / (fan_in + fan_out)) ** 0.5
        return std * jax.random.normal(k, (fan_in, fan_out), jnp.float32)

    def bias(k, fan_in, n_out):
        bound = 1.0 / (fan_in ** 0.5)
        return jax.random.uniform(k, (1, n_out), jnp.float32, -bound, bound)

    ks = jax.random.split(key, 10)
    return {
        # AttentionGRUCell (the dead Wr/Ur branch is omitted -- its output is unused)
        "W":  xavier(ks[0], H, H),     "b":  bias(ks[1], H, H),
        "U":  xavier(ks[2], H, H),     "ub": bias(ks[3], H, H),
        # attention scoring MLP (b2 is created for the reference but cancels in softmax)
        "W1": xavier(ks[4], 4 * H, H), "b1": bias(ks[5], 4 * H, H),
        "W2": xavier(ks[6], H, 1),     "b2": bias(ks[7], H, 1),
        # memory update
        "Wm": xavier(ks[8], 3 * H, H), "bm": bias(ks[9], 3 * H, H),
    }


def memory_module_ref(facts, questions, prevM, params):
    """Pure-JAX reference mirroring the PyTorch MemoryModule.forward."""
    S, B, H = facts.shape
    q, m = questions, prevM                      # (1, B, H) each, broadcast over S
    z = jnp.concatenate([facts * q, facts * m,
                         jnp.abs(facts - q), jnp.abs(facts - m)], axis=2)
    z = z.reshape(-1, 4 * H)
    g = jnp.tanh(z @ params["W1"] + params["b1"])
    g = g @ params["W2"] + params["b2"]          # (S*B, 1)
    gates = jax.nn.softmax(g.reshape(S, B), axis=1)   # F.softmax implicit dim on 2-D
    h = jnp.zeros((B, H), jnp.float32)
    for sid in range(S):
        fact = facts[sid]
        gate = gates[sid][:, None]
        h_hat = jnp.tanh(fact @ params["W"] + params["b"]
                         + h @ params["U"] + params["ub"])
        h = gate * h_hat + (1.0 - gate) * h
    concat = jnp.concatenate([m[0], h, q[0]], axis=1)
    return jax.nn.relu(concat @ params["Wm"] + params["bm"])[None]


if __name__ == "__main__":
    S, B, H = 8, 8, 32        # num_sentence, batch, hidden (= embedding) size

    key = jax.random.PRNGKey(0)
    kf, kq, km, kp = jax.random.split(key, 4)
    facts = jax.random.normal(kf, (S, B, H), jnp.float32)
    questions = jax.random.normal(kq, (1, B, H), jnp.float32)
    prevM = jax.random.normal(km, (1, B, H), jnp.float32)
    params = init_params(kp, H)
    packed = pack_params(params)

    nextM = jax.block_until_ready(memory_module(facts, questions, prevM, packed))
    ref = memory_module_ref(facts, questions, prevM, params)

    assert nextM.shape == (1, B, H)
    max_err = jnp.max(jnp.abs(nextM - ref))
    assert jnp.allclose(nextM, ref, atol=1e-4, rtol=1e-4), \
        f"mismatch vs reference: max abs err = {max_err}"
    print("KERNEL_OK")
</pallas_src>

<mosaic_0001>
module attributes {stable_mosaic.version = 11 : i64} {
  func.func @memory_module_kernel(%arg0: memref<8x8x32xf32, #tpu.memory_space<vmem>>, %arg1: memref<3x8x32xf32, #tpu.memory_space<vmem>>, %arg2: memref<288x32xf32, #tpu.memory_space<vmem>>, %arg3: memref<4x32xf32, #tpu.memory_space<vmem>>, %arg4: memref<8x32xf32, #tpu.memory_space<vmem>>) attributes {dimension_semantics = [], scalar_prefetch = 0 : i64, scratch_operands = 0 : i64, tpu.core_type = #tpu.core_type<tc>} {
    %c0 = arith.constant 0 : index
    %c0_0 = arith.constant 0 : index
    %c0_1 = arith.constant 0 : index
    %0 = vector.load %arg0[%c0, %c0_0, %c0_1] : memref<8x8x32xf32, #tpu.memory_space<vmem>>, vector<8x8x32xf32>
    %c0_2 = arith.constant 0 : index
    %c0_3 = arith.constant 0 : index
    %c0_4 = arith.constant 0 : index
    %1 = vector.load %arg1[%c0_2, %c0_3, %c0_4] : memref<3x8x32xf32, #tpu.memory_space<vmem>>, vector<3x8x32xf32>
    %2 = vector.extract_strided_slice %1 {offsets = [0, 0, 0], sizes = [1, 8, 32], strides = [1, 1, 1]} : vector<3x8x32xf32> to vector<1x8x32xf32>
    %3 = vector.shape_cast %2 : vector<1x8x32xf32> to vector<8x32xf32>
    %4 = vector.extract_strided_slice %1 {offsets = [1, 0, 0], sizes = [1, 8, 32], strides = [1, 1, 1]} : vector<3x8x32xf32> to vector<1x8x32xf32>
    %5 = vector.shape_cast %4 : vector<1x8x32xf32> to vector<8x32xf32>
    %6 = vector.extract_strided_slice %1 {offsets = [2, 0, 0], sizes = [1, 8, 8], strides = [1, 1, 1]} : vector<3x8x32xf32> to vector<1x8x8xf32>
    %7 = vector.shape_cast %6 : vector<1x8x8xf32> to vector<8x8xf32>
    %c0_5 = arith.constant 0 : index
    %c0_6 = arith.constant 0 : index
    %8 = vector.load %arg3[%c0_5, %c0_6] : memref<4x32xf32, #tpu.memory_space<vmem>>, vector<4x32xf32>
    %9 = vector.extract_strided_slice %8 {offsets = [0, 0], sizes = [1, 32], strides = [1, 1]} : vector<4x32xf32> to vector<1x32xf32>
    %10 = vector.extract_strided_slice %8 {offsets = [1, 0], sizes = [1, 32], strides = [1, 1]} : vector<4x32xf32> to vector<1x32xf32>
    %11 = vector.extract_strided_slice %8 {offsets = [2, 0], sizes = [1, 32], strides = [1, 1]} : vector<4x32xf32> to vector<1x32xf32>
    %12 = vector.extract_strided_slice %8 {offsets = [3, 0], sizes = [1, 32], strides = [1, 1]} : vector<4x32xf32> to vector<1x32xf32>
    %13 = vector.shape_cast %3 : vector<8x32xf32> to vector<1x8x32xf32>
    %14 = vector.broadcast %13 : vector<1x8x32xf32> to vector<8x8x32xf32>
    %15 = arith.mulf %0, %14 : vector<8x8x32xf32>
    %16 = vector.shape_cast %5 : vector<8x32xf32> to vector<1x8x32xf32>
    %17 = vector.broadcast %16 : vector<1x8x32xf32> to vector<8x8x32xf32>
    %18 = arith.mulf %0, %17 : vector<8x8x32xf32>
    %19 = vector.shape_cast %3 : vector<8x32xf32> to vector<1x8x32xf32>
    %20 = vector.broadcast %19 : vector<1x8x32xf32> to vector<8x8x32xf32>
    %21 = arith.subf %0, %20 : vector<8x8x32xf32>
    %22 = math.absf %21 : vector<8x8x32xf32>
    %23 = vector.shape_cast %5 : vector<8x32xf32> to vector<1x8x32xf32>
    %24 = vector.broadcast %23 : vector<1x8x32xf32> to vector<8x8x32xf32>
    %25 = arith.subf %0, %24 : vector<8x8x32xf32>
    %26 = math.absf %25 : vector<8x8x32xf32>
    %27 = tpu.concatenate %15, %18, %22, %26 in 2 : vector<8x8x32xf32>, vector<8x8x32xf32>, vector<8x8x32xf32>, vector<8x8x32xf32> -> vector<8x8x128xf32>
    %28 = vector.shape_cast %27 : vector<8x8x128xf32> to vector<64x128xf32>
    %c0_7 = arith.constant 0 : index
    %c0_8 = arith.constant 0 : index
    %29 = vector.load %arg2[%c0_7, %c0_8] : memref<288x32xf32, #tpu.memory_space<vmem>>, vector<128x32xf32>
    %cst = arith.constant dense<0.000000e+00> : vector<64x32xf32>
    %30 = tpu.matmul %28, %29, %cst {dimension_numbers = #tpu.dot_dimension_numbers<[1], [0], [0], [1], [0, 0, 1, 1], [], []>} : vector<64x128xf32>, vector<128x32xf32>, vector<64x32xf32> -> vector<64x32xf32>
    %31 = vector.broadcast %9 : vector<1x32xf32> to vector<64x32xf32>
    %32 = arith.addf %30, %31 : vector<64x32xf32>
    %33 = math.tanh %32 : vector<64x32xf32>
    %34 = vector.shape_cast %33 : vector<64x32xf32> to vector<8x8x32xf32>
    %35 = vector.shape_cast %12 : vector<1x32xf32> to vector<1x1x32xf32>
    %36 = vector.broadcast %35 : vector<1x1x32xf32> to vector<8x8x32xf32>
    %37 = arith.mulf %34, %36 : vector<8x8x32xf32>
    %cst_9 = arith.constant dense<0.000000e+00> : vector<8x8xf32>
    %38 = vector.multi_reduction <add>, %37, %cst_9 [2] : vector<8x8x32xf32> to vector<8x8xf32>
    %cst_10 = arith.constant dense<0xFF800000> : vector<8xf32>
    %39 = vector.multi_reduction <maximumf>, %38, %cst_10 [1] : vector<8x8xf32> to vector<8xf32>
    %40 = vector.shape_cast %39 : vector<8xf32> to vector<8x1xf32>
    %41 = vector.broadcast %40 : vector<8x1xf32> to vector<8x8xf32>
    %42 = arith.subf %38, %41 : vector<8x8xf32>
    %43 = math.exp %42 : vector<8x8xf32>
    %cst_11 = arith.constant dense<0.000000e+00> : vector<8xf32>
    %44 = vector.multi_reduction <add>, %43, %cst_11 [1] : vector<8x8xf32> to vector<8xf32>
    %45 = vector.shape_cast %44 : vector<8xf32> to vector<8x1xf32>
    %46 = vector.broadcast %45 : vector<8x1xf32> to vector<8x8xf32>
    %47 = arith.divf %43, %46 : vector<8x8xf32>
    "tpu.trace_start"() <{level = 10 : i32, message = "bk,sk->bs"}> : () -> ()
    %cst_12 = arith.constant dense<0.000000e+00> : vector<8x8xf32>
    %48 = tpu.matmul %7, %47, %cst_12 {dimension_numbers = #tpu.dot_dimension_numbers<[1], [1], [0], [0], [0, 0, 1, 0], [], []>} : vector<8x8xf32>, vector<8x8xf32>, vector<8x8xf32> -> vector<8x8xf32>
    "tpu.trace_stop"() : () -> ()
    %49 = vector.shape_cast %0 : vector<8x8x32xf32> to vector<64x32xf32>
    %c128 = arith.constant 128 : index
    %c0_13 = arith.constant 0 : index
    %50 = vector.load %arg2[%c128, %c0_13] : memref<288x32xf32, #tpu.memory_space<vmem>>, vector<32x32xf32>
    %cst_14 = arith.constant dense<0.000000e+00> : vector<64x32xf32>
    %51 = tpu.matmul %49, %50, %cst_14 {dimension_numbers = #tpu.dot_dimension_numbers<[1], [0], [0], [1], [0, 0, 1, 1], [], []>} : vector<64x32xf32>, vector<32x32xf32>, vector<64x32xf32> -> vector<64x32xf32>
    %52 = vector.broadcast %10 : vector<1x32xf32> to vector<64x32xf32>
    %53 = arith.addf %51, %52 : vector<64x32xf32>
    %54 = tpu.concatenate %5, %3 in 1 : vector<8x32xf32>, vector<8x32xf32> -> vector<8x64xf32>
    %c192 = arith.constant 192 : index
    %c0_15 = arith.constant 0 : index
    %55 = vector.load %arg2[%c192, %c0_15] : memref<288x32xf32, #tpu.memory_space<vmem>>, vector<64x32xf32>
    %cst_16 = arith.constant dense<0.000000e+00> : vector<8x32xf32>
    %56 = tpu.matmul %54, %55, %cst_16 {dimension_numbers = #tpu.dot_dimension_numbers<[1], [0], [0], [1], [0, 0, 1, 1], [], []>} : vector<8x64xf32>, vector<64x32xf32>, vector<8x32xf32> -> vector<8x32xf32>
    %57 = vector.broadcast %11 : vector<1x32xf32> to vector<8x32xf32>
    %58 = arith.addf %56, %57 : vector<8x32xf32>
    %c160 = arith.constant 160 : index
    %c0_17 = arith.constant 0 : index
    %59 = vector.load %arg2[%c160, %c0_17] : memref<288x32xf32, #tpu.memory_space<vmem>>, vector<32x32xf32>
    %cst_18 = arith.constant 0.000000e+00 : f32
    %60 = vector.broadcast %cst_18 : f32 to vector<8x32xf32>
    %61 = vector.extract_strided_slice %53 {offsets = [0, 0], sizes = [8, 32], strides = [1, 1]} : vector<64x32xf32> to vector<8x32xf32>
    %cst_19 = arith.constant dense<0.000000e+00> : vector<8x32xf32>
    %62 = tpu.matmul %60, %59, %cst_19 {dimension_numbers = #tpu.dot_dimension_numbers<[1], [0], [0], [1], [0, 0, 1, 1], [], []>} : vector<8x32xf32>, vector<32x32xf32>, vector<8x32xf32> -> vector<8x32xf32>
    %63 = arith.addf %61, %62 : vector<8x32xf32>
    %64 = math.tanh %63 : vector<8x32xf32>
    %65 = vector.extract_strided_slice %48 {offsets = [0, 0], sizes = [8, 1], strides = [1, 1]} : vector<8x8xf32> to vector<8x1xf32>
    %66 = arith.subf %64, %60 : vector<8x32xf32>
    %67 = vector.broadcast %65 : vector<8x1xf32> to vector<8x32xf32>
    %68 = arith.mulf %67, %66 : vector<8x32xf32>
    %69 = arith.addf %60, %68 : vector<8x32xf32>
    %70 = vector.extract_strided_slice %53 {offsets = [8, 0], sizes = [8, 32], strides = [1, 1]} : vector<64x32xf32> to vector<8x32xf32>
    %cst_20 = arith.constant dense<0.000000e+00> : vector<8x32xf32>
    %71 = tpu.matmul %69, %59, %cst_20 {dimension_numbers = #tpu.dot_dimension_numbers<[1], [0], [0], [1], [0, 0, 1, 1], [], []>} : vector<8x32xf32>, vector<32x32xf32>, vector<8x32xf32> -> vector<8x32xf32>
    %72 = arith.addf %70, %71 : vector<8x32xf32>
    %73 = math.tanh %72 : vector<8x32xf32>
    %74 = vector.extract_strided_slice %48 {offsets = [0, 1], sizes = [8, 1], strides = [1, 1]} : vector<8x8xf32> to vector<8x1xf32>
    %75 = arith.subf %73, %69 : vector<8x32xf32>
    %76 = vector.broadcast %74 : vector<8x1xf32> to vector<8x32xf32>
    %77 = arith.mulf %76, %75 : vector<8x32xf32>
    %78 = arith.addf %69, %77 : vector<8x32xf32>
    %79 = vector.extract_strided_slice %53 {offsets = [16, 0], sizes = [8, 32], strides = [1, 1]} : vector<64x32xf32> to vector<8x32xf32>
    %cst_21 = arith.constant dense<0.000000e+00> : vector<8x32xf32>
    %80 = tpu.matmul %78, %59, %cst_21 {dimension_numbers = #tpu.dot_dimension_numbers<[1], [0], [0], [1], [0, 0, 1, 1], [], []>} : vector<8x32xf32>, vector<32x32xf32>, vector<8x32xf32> -> vector<8x32xf32>
    %81 = arith.addf %79, %80 : vector<8x32xf32>
    %82 = math.tanh %81 : vector<8x32xf32>
    %83 = vector.extract_strided_slice %48 {offsets = [0, 2], sizes = [8, 1], strides = [1, 1]} : vector<8x8xf32> to vector<8x1xf32>
    %84 = arith.subf %82, %78 : vector<8x32xf32>
    %85 = vector.broadcast %83 : vector<8x1xf32> to vector<8x32xf32>
    %86 = arith.mulf %85, %84 : vector<8x32xf32>
    %87 = arith.addf %78, %86 : vector<8x32xf32>
    %88 = vector.extract_strided_slice %53 {offsets = [24, 0], sizes = [8, 32], strides = [1, 1]} : vector<64x32xf32> to vector<8x32xf32>
    %cst_22 = arith.constant dense<0.000000e+00> : vector<8x32xf32>
    %89 = tpu.matmul %87, %59, %cst_22 {dimension_numbers = #tpu.dot_dimension_numbers<[1], [0], [0], [1], [0, 0, 1, 1], [], []>} : vector<8x32xf32>, vector<32x32xf32>, vector<8x32xf32> -> vector<8x32xf32>
    %90 = arith.addf %88, %89 : vector<8x32xf32>
    %91 = math.tanh %90 : vector<8x32xf32>
    %92 = vector.extract_strided_slice %48 {offsets = [0, 3], sizes = [8, 1], strides = [1, 1]} : vector<8x8xf32> to vector<8x1xf32>
    %93 = arith.subf %91, %87 : vector<8x32xf32>
    %94 = vector.broadcast %92 : vector<8x1xf32> to vector<8x32xf32>
    %95 = arith.mulf %94, %93 : vector<8x32xf32>
    %96 = arith.addf %87, %95 : vector<8x32xf32>
    %97 = vector.extract_strided_slice %53 {offsets = [32, 0], sizes = [8, 32], strides = [1, 1]} : vector<64x32xf32> to vector<8x32xf32>
    %cst_23 = arith.constant dense<0.000000e+00> : vector<8x32xf32>
    %98 = tpu.matmul %96, %59, %cst_23 {dimension_numbers = #tpu.dot_dimension_numbers<[1], [0], [0], [1], [0, 0, 1, 1], [], []>} : vector<8x32xf32>, vector<32x32xf32>, vector<8x32xf32> -> vector<8x32xf32>
    %99 = arith.addf %97, %98 : vector<8x32xf32>
    %100 = math.tanh %99 : vector<8x32xf32>
    %101 = vector.extract_strided_slice %48 {offsets = [0, 4], sizes = [8, 1], strides = [1, 1]} : vector<8x8xf32> to vector<8x1xf32>
    %102 = arith.subf %100, %96 : vector<8x32xf32>
    %103 = vector.broadcast %101 : vector<8x1xf32> to vector<8x32xf32>
    %104 = arith.mulf %103, %102 : vector<8x32xf32>
    %105 = arith.addf %96, %104 : vector<8x32xf32>
    %106 = vector.extract_strided_slice %53 {offsets = [40, 0], sizes = [8, 32], strides = [1, 1]} : vector<64x32xf32> to vector<8x32xf32>
    %cst_24 = arith.constant dense<0.000000e+00> : vector<8x32xf32>
    %107 = tpu.matmul %105, %59, %cst_24 {dimension_numbers = #tpu.dot_dimension_numbers<[1], [0], [0], [1], [0, 0, 1, 1], [], []>} : vector<8x32xf32>, vector<32x32xf32>, vector<8x32xf32> -> vector<8x32xf32>
    %108 = arith.addf %106, %107 : vector<8x32xf32>
    %109 = math.tanh %108 : vector<8x32xf32>
    %110 = vector.extract_strided_slice %48 {offsets = [0, 5], sizes = [8, 1], strides = [1, 1]} : vector<8x8xf32> to vector<8x1xf32>
    %111 = arith.subf %109, %105 : vector<8x32xf32>
    %112 = vector.broadcast %110 : vector<8x1xf32> to vector<8x32xf32>
    %113 = arith.mulf %112, %111 : vector<8x32xf32>
    %114 = arith.addf %105, %113 : vector<8x32xf32>
    %115 = vector.extract_strided_slice %53 {offsets = [48, 0], sizes = [8, 32], strides = [1, 1]} : vector<64x32xf32> to vector<8x32xf32>
    %cst_25 = arith.constant dense<0.000000e+00> : vector<8x32xf32>
    %116 = tpu.matmul %114, %59, %cst_25 {dimension_numbers = #tpu.dot_dimension_numbers<[1], [0], [0], [1], [0, 0, 1, 1], [], []>} : vector<8x32xf32>, vector<32x32xf32>, vector<8x32xf32> -> vector<8x32xf32>
    %117 = arith.addf %115, %116 : vector<8x32xf32>
    %118 = math.tanh %117 : vector<8x32xf32>
    %119 = vector.extract_strided_slice %48 {offsets = [0, 6], sizes = [8, 1], strides = [1, 1]} : vector<8x8xf32> to vector<8x1xf32>
    %120 = arith.subf %118, %114 : vector<8x32xf32>
    %121 = vector.broadcast %119 : vector<8x1xf32> to vector<8x32xf32>
    %122 = arith.mulf %121, %120 : vector<8x32xf32>
    %123 = arith.addf %114, %122 : vector<8x32xf32>
    %124 = vector.extract_strided_slice %53 {offsets = [56, 0], sizes = [8, 32], strides = [1, 1]} : vector<64x32xf32> to vector<8x32xf32>
    %cst_26 = arith.constant dense<0.000000e+00> : vector<8x32xf32>
    %125 = tpu.matmul %123, %59, %cst_26 {dimension_numbers = #tpu.dot_dimension_numbers<[1], [0], [0], [1], [0, 0, 1, 1], [], []>} : vector<8x32xf32>, vector<32x32xf32>, vector<8x32xf32> -> vector<8x32xf32>
    %126 = arith.addf %124, %125 : vector<8x32xf32>
    %127 = math.tanh %126 : vector<8x32xf32>
    %128 = vector.extract_strided_slice %48 {offsets = [0, 7], sizes = [8, 1], strides = [1, 1]} : vector<8x8xf32> to vector<8x1xf32>
    %129 = arith.subf %127, %123 : vector<8x32xf32>
    %130 = vector.broadcast %128 : vector<8x1xf32> to vector<8x32xf32>
    %131 = arith.mulf %130, %129 : vector<8x32xf32>
    %132 = arith.addf %123, %131 : vector<8x32xf32>
    %c256 = arith.constant 256 : index
    %c0_27 = arith.constant 0 : index
    %133 = vector.load %arg2[%c256, %c0_27] : memref<288x32xf32, #tpu.memory_space<vmem>>, vector<32x32xf32>
    %cst_28 = arith.constant dense<0.000000e+00> : vector<8x32xf32>
    %134 = tpu.matmul %132, %133, %cst_28 {dimension_numbers = #tpu.dot_dimension_numbers<[1], [0], [0], [1], [0, 0, 1, 1], [], []>} : vector<8x32xf32>, vector<32x32xf32>, vector<8x32xf32> -> vector<8x32xf32>
    %135 = arith.addf %58, %134 : vector<8x32xf32>
    %cst_29 = arith.constant 0.000000e+00 : f32
    %136 = vector.broadcast %cst_29 : f32 to vector<8x32xf32>
    %137 = arith.maximumf %135, %136 : vector<8x32xf32>
    %c0_30 = arith.constant 0 : index
    %c0_31 = arith.constant 0 : index
    %138 = vector.load %arg4[%c0_30, %c0_31] : memref<8x32xf32, #tpu.memory_space<vmem>>, vector<8x32xf32>
    tpu.vector_store %arg4[%c0_30, %c0_31], %137 {strides = array<i32>} : memref<8x32xf32, #tpu.memory_space<vmem>>, vector<8x32xf32>,
    return
  }
}

</mosaic_0001>

<bundles_post_ra>
// kernel: memory_module.1
= control target key start
LH: loop header
LB: loop body
LE: loop exit
PB: predicated region body
PF: predicated region fallthrough
CT: control target
= control target key end

     0   :  { %s2223_s9 = smov 32   ;;  %s2224_s14 = smov 64   ;;  %s2815_s0 = inlined_call_operand.vmem [shape: f32[8,8,32], index: 0, kind: input, shape index: {}]   ;;  %s2816_s1 = inlined_call_operand.vmem [shape: f32[3,8,32], index: 1, kind: input, shape index: {}]   ;;  %s2817_s2 = inlined_call_operand.vmem [shape: f32[288,32], index: 2, kind: input, shape index: {}]   ;;  %s2818_s3 = inlined_call_operand.vmem [shape: f32[4,32], index: 3, kind: input, shape index: {}]   ;;  %s2819_s4 = inlined_call_operand.hbm [shape: f32[8,32], index: 4, kind: output, shape index: {}]  }
   0x1   :  { %v2265_v0 = vld [vmem:[%s2815_s0] sm:$0xff]  ;;  %v2270_v1 = vld [vmem:[%s2815_s0 + $0x8] sm:$0xff]  ;;  %v2284_v5 = vld [vmem:[%s2815_s0 + $0x10] sm:$0xff]  ;;  %s2225_s21 = smov 96  }
   0x2   :  { %v2275_v2 = vld [vmem:[%s2816_s1 + $0x8] sm:$0xff]  ;;  %v2289_v6 = vld [vmem:[%s2815_s0 + $0x18] sm:$0xff]  ;;  %v2294_v7 = vld [vmem:[%s2816_s1] sm:$0xff] }
   0x3   :  { %v38_v3 = vmul.f32 %v2275_v2, %v2265_v0  ;;  %v39_v4 = vmul.f32 %v2275_v2, %v2270_v1  ;;  %v62_v8 = vsub.f32 %v2265_v0, %v2275_v2  ;;  %v63_v9 = vsub.f32 %v2270_v1, %v2275_v2  ;;  %v2313_v18 = vld [vmem:[%s2815_s0 + $0x20] sm:$0xff]  ;;  %v216_v19 = vld [vmem:[%s2817_s2 + $0x78] sm:$0xff]  ;;  %v2323_v24 = vld [vmem:[%s2815_s0 + $0x28] sm:$0xff] }
   0x4   :  { %v40_v10 = vmul.f32 %v2275_v2, %v2284_v5  ;;  %v41_v11 = vmul.f32 %v2275_v2, %v2289_v6  ;;  %v46_v12 = vsub.f32 %v2265_v0, %v2294_v7  ;;  %v47_v13 = vsub.f32 %v2270_v1, %v2294_v7  ;;  %1866 = vmatprep.subr.mxu0 %v216_v19  ;;  %v215_v25 = vld [vmem:[%s2817_s2 + $0x70] sm:$0xff]  ;;  %v214_v29 = vld [vmem:[%s2817_s2 + $0x68] sm:$0xff]  ;;  %v213_v37 = vld [vmem:[%s2817_s2 + $0x60] sm:$0xff] }
   0x5   :  { %v2067_v14 = vpack.i.bf16 %v39_v4, %v38_v3  ;;  %v70_v15 = vand.u32 2147483647, %v62_v8  ;;  %v71_v16 = vand.u32 2147483647, %v63_v9  ;;  %v48_v17 = vsub.f32 %v2284_v5, %v2294_v7  ;;  %1867 = vmatpush3.msra.mxu0 %v216_v19  ;;  %v2356_v43 = vld [vmem:[%s2815_s0 + $0x30] sm:$0xff]  ;;  %v2361_v44 = vld [vmem:[%s2815_s0 + $0x38] sm:$0xff] }
   0x6   :  { %v2072_v20 = vpack.i.bf16 %v41_v11, %v40_v10  ;;  %v54_v21 = vand.u32 2147483647, %v46_v12  ;;  %v55_v22 = vand.u32 2147483647, %v47_v13  ;;  %v49_v23 = vsub.f32 %v2289_v6, %v2294_v7  ;;  %1868 = vmatprep.subr.mxu0 %v215_v25  ;;  %v212_v45 = vld [vmem:[%s2817_s2 + $0x58] sm:$0xff] }
   0x7   :  { %2068 = vrot.lane.b32.xlu0 %v2067_v14, %s2223_s9  ;;  %v56_v26 = vand.u32 2147483647, %v48_v17  ;;  %v64_v27 = vsub.f32 %v2284_v5, %v2275_v2  ;;  %v65_v28 = vsub.f32 %v2289_v6, %v2275_v2  ;;  %v2082_v31 = vpack.i.bf16 %v71_v16, %v70_v15  ;;  %1869 = vmatpush3.msra.mxu0 %v215_v25 }
   0x8   :  { %2073 = vrot.lane.b32.xlu1 %v2072_v20, %s2223_s9  ;;  %v2077_v30 = vpack.i.bf16 %v55_v22, %v54_v21  ;;  %v57_v32 = vand.u32 2147483647, %v49_v23  ;;  %v50_v35 = vsub.f32 %v2313_v18, %v2294_v7  ;;  %v51_v36 = vsub.f32 %v2323_v24, %v2294_v7  ;;  %1870 = vmatprep.subr.mxu0 %v214_v29 }
   0x9   :  { %v72_v33 = vand.u32 2147483647, %v64_v27  ;;  %v73_v34 = vand.u32 2147483647, %v65_v28  ;;  %v42_v38 = vmul.f32 %v2275_v2, %v2313_v18  ;;  %v43_v39 = vmul.f32 %v2275_v2, %v2323_v24  ;;  %1871 = vmatpush3.msra.mxu0 %v214_v29 }
   0xa   :  { %v66_v40 = vsub.f32 %v2313_v18, %v2275_v2  ;;  %v2087_v41 = vpack.i.bf16 %v57_v32, %v56_v26  ;;  %v67_v42 = vsub.f32 %v2323_v24, %v2275_v2  ;;  %v58_v47 = vand.u32 2147483647, %v50_v35  ;;  %1872 = vmatprep.subr.mxu0 %v213_v37 }
   0xb   :  { %2078 = vrot.lane.b32.xlu0 %v2077_v30, %s2224_s14  ;;  %v2092_v46 = vpack.i.bf16 %v73_v34, %v72_v33  ;;  %v59_v48 = vand.u32 2147483647, %v51_v36 }
   0xc   :  { %2083 = vrot.lane.b32.xlu1 %v2082_v31, %s2225_s21 }
   0xd   :  { %9 = vsyncpa [#allocation3], 0  ;;  %1873 = vmatpush3.msra.mxu0 %v213_v37  ;;  %v211_v49 = vld [vmem:[%s2817_s2 + $0x50] sm:$0xff]  ;;  %v2097_v50 = vpack.i.bf16 %v43_v39, %v42_v38  ;;  %v74_v51 = vand.u32 2147483647, %v66_v40  ;;  %v44_v52 = vmul.f32 %v2275_v2, %v2356_v43  ;;  %v45_v54 = vmul.f32 %v2275_v2, %v2361_v44  ;;  %v210_v57 = vld [vmem:[%s2817_s2 + $0x48] sm:$0xff] }
   0xe   :  { %1874 = vmatprep.subr.mxu0 %v212_v45  ;;  %v75_v53 = vand.u32 2147483647, %v67_v42  ;;  %v52_v55 = vsub.f32 %v2356_v43, %v2294_v7  ;;  %v53_v56 = vsub.f32 %v2361_v44, %v2294_v7  ;;  %v2102_v58 = vpack.i.bf16 %v59_v48, %v58_v47  ;;  %v209_v61 = vld [vmem:[%s2817_s2 + $0x40] sm:$0xff]  ;;  %v208_v4 = vld [vmem:[%s2817_s2 + $0x38] sm:$0xff]  ;;  %v207_v10 = vld [vmem:[%s2817_s2 + $0x30] sm:$0xff] }
   0xf   :  { %2088 = vrot.lane.b32.xlu0 %v2087_v41, %s2224_s14  ;;  %1875 = vmatpush3.msra.mxu0 %v212_v45  ;;  %v68_v59 = vsub.f32 %v2356_v43, %v2275_v2  ;;  %v69_v60 = vsub.f32 %v2361_v44, %v2275_v2  ;;  %v2112_v2 = vpack.i.bf16 %v45_v54, %v44_v52  ;;  %v206_v12 = vld [vmem:[%s2817_s2 + $0x28] sm:$0xff]  ;;  %v205_v14 = vld [vmem:[%s2817_s2 + $0x20] sm:$0xff]  ;;  %v204_v15 = vld [vmem:[%s2817_s2 + $0x18] sm:$0xff]  ;;  %vm174_vm0 = vcmask 261120  }
  0x10   :  { %2093 = vrot.lane.b32.xlu1 %v2092_v46, %s2225_s21  ;;  %1876 = vmatprep.subr.mxu0 %v211_v49  ;;  %v2107_v62 = vpack.i.bf16 %v75_v53, %v74_v51  ;;  %v60_v63 = vand.u32 2147483647, %v52_v55  ;;  %v61_v3 = vand.u32 2147483647, %v53_v56  ;;  %v203_v16 = vld [vmem:[%s2817_s2 + $0x10] sm:$0xff]  ;;  %v202_v17 = vld [vmem:[%s2817_s2 + $0x8] sm:$0xff]  ;;  %v30_v25 = vmul.f32 %v2294_v7, %v2265_v0 }
  0x11   :  { %1877 = vmatpush3.msra.mxu0 %v211_v49  ;;  %v76_v8 = vand.u32 2147483647, %v68_v59  ;;  %v77_v9 = vand.u32 2147483647, %v69_v60  ;;  %v201_v19 = vld [vmem:[%s2817_s2] sm:$0xff]  ;;  %v31_v26 = vmul.f32 %v2294_v7, %v2270_v1  ;;  %vm183_vm1 = vcmask 523264  }
  0x12   :  { %1878 = vmatprep.subr.mxu0 %v210_v57  ;;  %v2117_v11 = vpack.i.bf16 %v61_v3, %v60_v63  ;;  %vm192_vm2 = vcmask 785408   ;;  %v32_v28 = vmul.f32 %v2294_v7, %v2284_v5  ;;  %v33_v29 = vmul.f32 %v2294_v7, %v2289_v6 }
  0x13   :  { %2098 = vrot.lane.b32.xlu0 %v2097_v50, %s2223_s9  ;;  %1879 = vmatpush3.msra.mxu0 %v210_v57  ;;  %v2122_v13 = vpack.i.bf16 %v77_v9, %v76_v8  ;;  %v34_v55 = vmul.f32 %v2294_v7, %v2313_v18  ;;  %v35_v56 = vmul.f32 %v2294_v7, %v2323_v24  ;;  %vm412_vm3 = vcmask 1041409  }
  0x14   :  { %2103 = vrot.lane.b32.xlu1 %v2102_v58, %s2224_s14  ;;  %1880 = vmatprep.subr.mxu0 %v209_v61  ;;  %vm414_vm4 = vcmask 1042434   ;;  %vm416_vm5 = vcmask 1043459   ;;  %vm418_vm6 = vcmask 1044484   ;;  %vm420_vm7 = vcmask 1045509  }
  0x15   :  { %1881 = vmatpush3.msra.mxu0 %v209_v61  ;;  %vm422_vm8 = vcmask 1046534   ;;  %vm424_vm9 = vcmask 1047559   ;;  %vm427_vm10 = vcmask 64512   ;;  %vm2228_vm11 = vmmov 0  }
  0x16   :  { %1882 = vmatprep.subr.mxu0 %v208_v4 }
  0x17   :  { %2108 = vrot.lane.b32.xlu0 %v2107_v62, %s2225_s21  ;;  %1883 = vmatpush3.msra.mxu0 %v208_v4 }
  0x18   :  { %2113 = vrot.lane.b32.xlu1 %v2112_v2, %s2223_s9  ;;  %1884 = vmatprep.subr.mxu0 %v207_v10 }
  0x19   :  { %1885 = vmatpush3.msra.mxu0 %v207_v10 }
  0x1a   :  { %1886 = vmatprep.subr.mxu0 %v206_v12 }
  0x1b   :  { %2118 = vrot.lane.b32.xlu0 %v2117_v11, %s2224_s14  ;;  %1887 = vmatpush3.msra.mxu0 %v206_v12  ;;  %v36_v12 = vmul.f32 %v2294_v7, %v2356_v43 }
  0x1c   :  { %2123 = vrot.lane.b32.xlu1 %v2122_v13, %s2225_s21  ;;  %1888 = vmatprep.subr.mxu0 %v205_v14  ;;  %v37_v13 = vmul.f32 %v2294_v7, %v2361_v44 }
  0x1d   :  { %1889 = vmatpush3.msra.mxu0 %v205_v14 }
  0x1e   :  { %1890 = vmatprep.subr.mxu0 %v204_v15 }
  0x1f   :  { %1891 = vmatpush3.msra.mxu0 %v204_v15 }
  0x20   :  { %1892 = vmatprep.subr.mxu0 %v203_v16 }
  0x21   :  { %1893 = vmatpush3.msra.mxu0 %v203_v16 }
  0x22   :  { %1894 = vmatprep.subr.mxu0 %v202_v17 }
  0x23   :  { %1895 = vmatpush3.msra.mxu0 %v202_v17 }
  0x24   :  { %1896 = vmatprep.subr.mxu0 %v201_v19 }
  0x25   :  { %1897 = vmatpush3.msra.mxu0 %v201_v19 }
  0x79   :  { %v2069_v20 = vpop.permute.xlu0 %2068 }
  0x7a   :  { %v2074_v21 = vpop.permute.xlu1 %2073  ;;  %v2071_v22 = vunpack.i.h.bf16 %v2069_v20  ;;  %v2070_v23 = vunpack.i.l.bf16 %v2069_v20 }
  0x7b   :  { %v2076_v30 = vunpack.i.h.bf16 %v2074_v21  ;;  %v2075_v31 = vunpack.i.l.bf16 %v2074_v21 }
  0x7c   :  { %v175_v37 = vsel %vm174_vm0, %v30_v25, %v2070_v23  ;;  %v176_v38 = vsel %vm174_vm0, %v31_v26, %v2071_v22 }
  0x7d   :  { %v2079_v27 = vpop.permute.xlu0 %2078  ;;  %v177_v51 = vsel %vm174_vm0, %v32_v28, %v2075_v31  ;;  %v178_v52 = vsel %vm174_vm0, %v33_v29, %v2076_v30 }
  0x7e   :  { %v2081_v32 = vunpack.i.h.bf16 %v2079_v27  ;;  %v2080_v33 = vunpack.i.l.bf16 %v2079_v27  ;;  %v2084_v34 = vpop.permute.xlu1 %2083 }
  0x7f   :  { %v2086_v35 = vunpack.i.h.bf16 %v2084_v34  ;;  %v2085_v36 = vunpack.i.l.bf16 %v2084_v34  ;;  %v217_v34 = vlaneseq }
  0x80   :  { %v184_v39 = vsel %vm183_vm1, %v175_v37, %v2080_v33  ;;  %v185_v40 = vsel %vm183_vm1, %v176_v38, %v2081_v32  ;;  %v2468_v37 = vld [vmem:[%s2818_s3] sm:$0xf] }
  0x81   :  { %v2089_v41 = vpop.permute.xlu0 %2088  ;;  %v193_v42 = vsel %vm192_vm2, %v184_v39, %v2085_v36  ;;  %v194_v45 = vsel %vm192_vm2, %v185_v40, %v2086_v35  ;;  %v2460_v35 = vshrl.u32 %v217_v34, 7 }
  0x82   :  { %v2091_v46 = vunpack.i.h.bf16 %v2089_v41  ;;  %v2090_v47 = vunpack.i.l.bf16 %v2089_v41  ;;  %v2094_v48 = vpop.permute.xlu1 %2093  ;;  %1898 = vmatprep.mubr.f32.mxu0 %v193_v42 }
  0x83   :  { %v2096_v49 = vunpack.i.h.bf16 %v2094_v48  ;;  %v2095_v50 = vunpack.i.l.bf16 %v2094_v48  ;;  %1899 = vmatmul.mubr.f32.vlgmr.msra.gmra.mxu0 %v194_v45  ;;  %v2463_v36 = vsub.s32 0, %v2460_v35 }
  0x84   :  { %v186_v53 = vsel %vm183_vm1, %v177_v51, %v2090_v47  ;;  %v187_v54 = vsel %vm183_vm1, %v178_v52, %v2091_v46 }
  0x85   :  { %v2099_v57 = vpop.permute.xlu0 %2098  ;;  %v195_v58 = vsel %vm192_vm2, %v186_v53, %v2095_v50  ;;  %v196_v59 = vsel %vm192_vm2, %v187_v54, %v2096_v49  ;;  %v220_v38 = vrot.slane %v2468_v37, %v2463_v36  ;;  %v2473_v49 = vsub.s32 3, %v2460_v35 }
  0x86   :  { %v2101_v60 = vunpack.i.h.bf16 %v2099_v57  ;;  %v2100_v61 = vunpack.i.l.bf16 %v2099_v57  ;;  %v2104_v62 = vpop.permute.xlu1 %2103  ;;  %1901 = vmatprep.mubr.f32.mxu0 %v195_v58 }
  0x87   :  { %v2106_v63 = vunpack.i.h.bf16 %v2104_v62  ;;  %v2105_v3 = vunpack.i.l.bf16 %v2104_v62  ;;  %1902 = vmatmul.mubr.f32.gmra.mxu0 %v196_v59  ;;  %v337_v53 = vrot.slane %v2468_v37, %v2473_v49 }
  0x88   :  { %v179_v4 = vsel %vm174_vm0, %v34_v55, %v2100_v61  ;;  %v180_v2 = vsel %vm174_vm0, %v35_v56, %v2101_v60 }
  0x89   :  { %v2109_v8 = vpop.permute.xlu0 %2108  ;;  %v188_v16 = vsel %vm183_vm1, %v179_v4, %v2105_v3  ;;  %v189_v17 = vsel %vm183_vm1, %v180_v2, %v2106_v63 }
  0x8a   :  { %v2111_v9 = vunpack.i.h.bf16 %v2109_v8  ;;  %v2110_v10 = vunpack.i.l.bf16 %v2109_v8  ;;  %v2114_v11 = vpop.permute.xlu1 %2113 }
  0x8b   :  { %v2116_v14 = vunpack.i.h.bf16 %v2114_v11  ;;  %v2115_v15 = vunpack.i.l.bf16 %v2114_v11 }
  0x8c   :  { %v197_v19 = vsel %vm192_vm2, %v188_v16, %v2110_v10  ;;  %v198_v20 = vsel %vm192_vm2, %v189_v17, %v2111_v9 }
  0x8d   :  { %v2119_v21 = vpop.permute.xlu0 %2118  ;;  %1904 = vmatprep.mubr.f32.mxu0 %v197_v19  ;;  %v181_v28 = vsel %vm174_vm0, %v36_v12, %v2115_v15  ;;  %v182_v29 = vsel %vm174_vm0, %v37_v13, %v2116_v14 }
  0x8e   :  { %v2121_v22 = vunpack.i.h.bf16 %v2119_v21  ;;  %v2120_v23 = vunpack.i.l.bf16 %v2119_v21  ;;  %v2124_v25 = vpop.permute.xlu1 %2123  ;;  %1905 = vmatmul.mubr.f32.gmra.mxu0 %v198_v20 }
  0x8f   :  { %v2126_v26 = vunpack.i.h.bf16 %v2124_v25  ;;  %v2125_v27 = vunpack.i.l.bf16 %v2124_v25 }
  0x90   :  { %v190_v30 = vsel %vm183_vm1, %v181_v28, %v2120_v23  ;;  %v191_v31 = vsel %vm183_vm1, %v182_v29, %v2121_v22 }
  0x91   :  { %v199_v32 = vsel %vm192_vm2, %v190_v30, %v2125_v27  ;;  %v200_v33 = vsel %vm192_vm2, %v191_v31, %v2126_v26  ;;  %v379_v26 = vand.u32 127, %v217_v34 }
  0x92   :  { %1907 = vmatprep.mubr.f32.mxu0 %v199_v32 }
  0x93   :  { %1908 = vmatmul.mubr.f32.gmra.mxu0 %v200_v33  ;;  %v2486_v28 = vsub.s32 %v379_v26, %v2460_v35 }
 0x143   :  { %v1900_v39 = vpop.f32.mrf.mxu0 }
 0x144   :  { %v293_v40 = vadd.f32 %v1900_v39, %v220_v38 }
 0x145   :  { %v287_v41 = vpop.f32.mrf.mxu0 }
 0x146   :  { %2136 = vtanh.f32 %v293_v40  ;;  %v288_v42 = vadd.f32 %v287_v41, %v220_v38 }
 0x147   :  { %v1903_v45 = vpop.f32.mrf.mxu0 }
 0x148   :  { %2138 = vtanh.f32 %v288_v42  ;;  %v303_v46 = vadd.f32 %v1903_v45, %v220_v38 }
 0x149   :  { %v297_v47 = vpop.f32.mrf.mxu0 }
 0x14a   :  { %2140 = vtanh.f32 %v303_v46  ;;  %v298_v48 = vadd.f32 %v297_v47, %v220_v38 }
 0x14c   :  { %2142 = vtanh.f32 %v298_v48 }
 0x14e   :  { %v1906_v50 = vpop.f32.mrf.mxu0 }
 0x14f   :  { %v313_v51 = vadd.f32 %v1906_v50, %v220_v38 }
 0x150   :  { %v307_v52 = vpop.f32.mrf.mxu0 }
 0x151   :  { %2144 = vtanh.f32 %v313_v51  ;;  %v308_v54 = vadd.f32 %v307_v52, %v220_v38 }
 0x153   :  { %v2137_v55 = vpop.eup %2136  ;;  %2146 = vtanh.f32 %v308_v54  ;;  %v1909_v56 = vpop.f32.mrf.mxu0 }
 0x154   :  { %v323_v57 = vadd.f32 %v1909_v56, %v220_v38  ;;  %v339_v58 = vmul.f32 %v2137_v55, %v337_v53 }
 0x155   :  { %v2139_v59 = vpop.eup %2138  ;;  %v317_v60 = vpop.f32.mrf.mxu0 }
 0x156   :  { %2148 = vtanh.f32 %v323_v57  ;;  %v318_v61 = vadd.f32 %v317_v60, %v220_v38  ;;  %v349_v62 = vsel %vm174_vm0, %v339_v58, 0.0  ;;  %v338_v63 = vmul.f32 %v2139_v59, %v337_v53 }
 0x157   :  { %v2141_v3 = vpop.eup %2140  ;;  %350 = vadd.xlane.f32.xlu1 %v349_v62  ;;  %v2226_v58 = vmov 0   ;;  %v2505_v59 = vsub.s32 1, %v2460_v35  ;;  %v2508_v60 = vsub.s32 2, %v2460_v35 }
 0x158   :  { %2150 = vtanh.f32 %v318_v61  ;;  %v346_v4 = vsel %vm174_vm0, %v338_v63, 0.0  ;;  %v341_v2 = vmul.f32 %v2141_v3, %v337_v53  ;;  %2128 = vset.pattern.permute.xlu1 %v2226_v58  ;;  %2127 = vset.pattern.permute.xlu0 %v2226_v58 }
 0x159   :  { %v2143_v8 = vpop.eup %2142  ;;  %347 = vadd.xlane.f32.xlu0 %v346_v4 }
 0x15a   :  { %v355_v9 = vsel %vm174_vm0, %v341_v2, 0.0  ;;  %v340_v10 = vmul.f32 %v2143_v8, %v337_v53  ;;  %v450_v8 = vsub.s32 4, %v2460_v35 }
 0x15c   :  { %v352_v13 = vsel %vm174_vm0, %v340_v10, 0.0 }
 0x15d   :  { %356 = vadd.xlane.f32.xlu0 %v355_v9 }
 0x15e   :  { %v2145_v11 = vpop.eup %2144 }
 0x15f   :  { %v343_v14 = vmul.f32 %v2145_v11, %v337_v53 }
 0x160   :  { %v2147_v12 = vpop.eup %2146 }
 0x161   :  { %353 = vadd.xlane.f32.xlu0 %v352_v13  ;;  %v342_v15 = vmul.f32 %v2147_v12, %v337_v53  ;;  %v361_v19 = vsel %vm174_vm0, %v343_v14, 0.0  ;;  %v454_v13 = vsub.s32 5, %v2460_v35 }
 0x163   :  { %v2149_v16 = vpop.eup %2148  ;;  %v358_v17 = vsel %vm174_vm0, %v342_v15, 0.0 }
 0x164   :  { %359 = vadd.xlane.f32.xlu1 %v358_v17  ;;  %v345_v20 = vmul.f32 %v2149_v16, %v337_v53  ;;  %v458_v17 = vsub.s32 6, %v2460_v35 }
 0x165   :  { %v2151_v21 = vpop.eup %2150  ;;  %362 = vadd.xlane.f32.xlu0 %v361_v19 }
 0x166   :  { %v344_v22 = vmul.f32 %v2151_v21, %v337_v53  ;;  %v367_v25 = vsel %vm174_vm0, %v345_v20, 0.0 }
 0x168   :  { %v364_v23 = vsel %vm174_vm0, %v344_v22, 0.0  ;;  %v462_v22 = vsub.s32 7, %v2460_v35  ;;  %v2227_v35 = vmov 0.0  }
 0x169   :  { %365 = vadd.xlane.f32.xlu1 %v364_v23  ;;  %368 = vadd.xlane.f32.xlu0 %v367_v25 }
 0x16a   :  { %1910 = vmatprep.subr.mxu1 %v2227_v35  ;;  %1976 = vmatprep.subr.mxu0 %v2227_v35 }
 0x16b   :  { %1912 = vmatprep.mubr.msk.f32.mxu1 %vm2228_vm11, %v2227_v35  ;;  %1984 = vmatprep.mubr.msk.f32.mxu0 %vm2228_vm11, %v2227_v35 }
 0x1e0   :  { %v351_v30 = vpop.xlane.xlu1 %350 }
 0x1e1   :  { %v387_v32 = vrot.slane %v351_v30, %v2486_v28 }
 0x1e2   :  { %v348_v27 = vpop.xlane.xlu0 %347 }
 0x1e3   :  { %v383_v31 = vrot.slane %v348_v27, %v2486_v28 }
 0x1e5   :  { %v413_v39 = vsel %vm412_vm3, %v387_v32, %v383_v31 }
 0x1e6   :  { %v357_v29 = vpop.xlane.xlu0 %356 }
 0x1e7   :  { %v395_v34 = vrot.slane %v357_v29, %v2486_v28 }
 0x1ea   :  { %v354_v33 = vpop.xlane.xlu0 %353 }
 0x1eb   :  { %v391_v38 = vrot.slane %v354_v33, %v2486_v28 }
 0x1ed   :  { %v415_v40 = vsel %vm414_vm4, %v391_v38, %v413_v39  ;;  %v360_v41 = vpop.xlane.xlu1 %359 }
 0x1ee   :  { %v399_v42 = vrot.slane %v360_v41, %v2486_v28  ;;  %v417_v45 = vsel %vm416_vm5, %v395_v34, %v415_v40  ;;  %v363_v46 = vpop.xlane.xlu0 %362 }
 0x1ef   :  { %v403_v47 = vrot.slane %v363_v46, %v2486_v28 }
 0x1f0   :  { %v419_v48 = vsel %vm418_vm6, %v399_v42, %v417_v45 }
 0x1f1   :  { %v421_v54 = vsel %vm420_vm7, %v403_v47, %v419_v48 }
 0x1f2   :  { %v366_v50 = vpop.xlane.xlu1 %365  ;;  %v369_v51 = vpop.xlane.xlu0 %368 }
 0x1f3   :  { %v407_v52 = vrot.slane %v366_v50, %v2486_v28  ;;  %v411_v53 = vrot.slane %v369_v51, %v2486_v28 }
 0x1f5   :  { %v423_v55 = vsel %vm422_vm8, %v407_v52, %v421_v54 }
 0x1f6   :  { %v425_v56 = vsel %vm424_vm9, %v411_v53, %v423_v55 }
 0x1f7   :  { %v428_v57 = vsel %vm427_vm10, %v425_v56, -inf }
 0x1f8   :  { %429 = vmax.xlane.f32.xlu1 %v428_v57 }
 0x281   :  { %v430_v61 = vpop.xlane.xlu1 %429 }
 0x282   :  { %v435_v62 = vrot.slane %v430_v61, %v2463_v36  ;;  %v439_v63 = vrot.slane %v430_v61, %v2505_v59  ;;  %v443_v3 = vrot.slane %v430_v61, %v2508_v60  ;;  %v447_v9 = vrot.slane %v430_v61, %v2473_v49 }
 0x283   :  { %v451_v14 = vrot.slane %v430_v61, %v450_v8  ;;  %v455_v19 = vrot.slane %v430_v61, %v454_v13  ;;  %v459_v23 = vrot.slane %v430_v61, %v458_v17 }
 0x284   :  { %v472_v4 = vsub.f32 %v348_v27, %v435_v62  ;;  %v473_v2 = vsub.f32 %v351_v30, %v439_v63  ;;  %v474_v10 = vsub.f32 %v354_v33, %v443_v3  ;;  %v475_v15 = vsub.f32 %v357_v29, %v447_v9 }
 0x285   :  { %v476_v20 = vsub.f32 %v360_v41, %v451_v14  ;;  %v477_v25 = vsub.f32 %v363_v46, %v455_v19  ;;  %v463_v29 = vrot.slane %v430_v61, %v462_v22  ;;  %v478_v30 = vsub.f32 %v366_v50, %v459_v23 }
 0x286   :  { %v480_v11 = vmul.f32 1.442695, %v472_v4  ;;  %v482_v12 = vmul.f32 1.442695, %v473_v2  ;;  %v484_v16 = vmul.f32 1.442695, %v474_v10 }
 0x287   :  { %v486_v21 = vmul.f32 1.442695, %v475_v15  ;;  %v488_v26 = vmul.f32 1.442695, %v476_v20  ;;  %v490_v31 = vmul.f32 1.442695, %v477_v25  ;;  %v479_v33 = vsub.f32 %v369_v51, %v463_v29 }
 0x288   :  { %2152 = vpow2.f32 %v480_v11  ;;  %v492_v38 = vmul.f32 1.442695, %v478_v30 }
 0x289   :  { %2154 = vpow2.f32 %v482_v12  ;;  %v494_v34 = vmul.f32 1.442695, %v479_v33 }
 0x28a   :  { %2156 = vpow2.f32 %v484_v16 }
 0x28b   :  { %2158 = vpow2.f32 %v486_v21 }
 0x28c   :  { %2160 = vpow2.f32 %v488_v26 }
 0x28d   :  { %2162 = vpow2.f32 %v490_v31 }
 0x28e   :  { %2164 = vpow2.f32 %v492_v38 }
 0x28f   :  { %2166 = vpow2.f32 %v494_v34 }
 0x295   :  { %v2153_v27 = vpop.eup %2152 }
 0x296   :  { %v2155_v32 = vpop.eup %2154  ;;  %505 = vperm.xlu0 %2127, %v2153_v27  }
 0x297   :  { %508 = vperm.xlu1 %2128, %v2155_v32   ;;  %v2157_v39 = vpop.eup %2156 }
 0x298   :  { %v2159_v40 = vpop.eup %2158 }
 0x299   :  { %v2526_v41 = vpop.eup %2160 }
 0x29a   :  { %v2529_v42 = vpop.eup %2162 }
 0x29b   :  { %511 = vperm.xlu1 %2128, %v2157_v39   ;;  %v2532_v45 = vpop.eup %2164 }
 0x29c   :  { %v2535_v46 = vpop.eup %2166 }
 0x29f   :  { %514 = vperm.xlu1 %2128, %v2159_v40  }
 0x2a3   :  { %517 = vperm.xlu1 %2128, %v2526_v41  }
 0x2a7   :  { %520 = vperm.xlu1 %2128, %v2529_v42  }
 0x2ab   :  { %523 = vperm.xlu1 %2128, %v2532_v45  }
 0x2af   :  { %526 = vperm.xlu1 %2128, %v2535_v46  }
 0x311   :  { %v506_v52 = vpop.permute.xlu0 %505 }
 0x312   :  { %v509_v47 = vpop.permute.xlu1 %508  ;;  %v531_v55 = vrot.slane %v506_v52, %v2486_v28 }
 0x313   :  { %v535_v54 = vrot.slane %v509_v47, %v2486_v28 }
 0x315   :  { %v560_v62 = vsel %vm412_vm3, %v535_v54, %v531_v55 }
 0x316   :  { %v512_v48 = vpop.permute.xlu1 %511 }
 0x317   :  { %v539_v56 = vrot.slane %v512_v48, %v2486_v28 }
 0x319   :  { %v561_v3 = vsel %vm414_vm4, %v539_v56, %v560_v62 }
 0x31a   :  { %v515_v50 = vpop.permute.xlu1 %514 }
 0x31b   :  { %v543_v57 = vrot.slane %v515_v50, %v2486_v28 }
 0x31d   :  { %v562_v2 = vsel %vm416_vm5, %v543_v57, %v561_v3 }
 0x31e   :  { %v518_v51 = vpop.permute.xlu1 %517 }
 0x31f   :  { %v547_v58 = vrot.slane %v518_v51, %v2486_v28 }
 0x321   :  { %v563_v9 = vsel %vm418_vm6, %v547_v58, %v562_v2 }
 0x322   :  { %v521_v53 = vpop.permute.xlu1 %520 }
 0x323   :  { %v551_v63 = vrot.slane %v521_v53, %v2486_v28 }
 0x325   :  { %v564_v11 = vsel %vm420_vm7, %v551_v63, %v563_v9 }
 0x326   :  { %v524_v61 = vpop.permute.xlu1 %523 }
 0x327   :  { %v555_v4 = vrot.slane %v524_v61, %v2486_v28 }
 0x329   :  { %v565_v14 = vsel %vm422_vm8, %v555_v4, %v564_v11 }
 0x32a   :  { %v527_v10 = vpop.permute.xlu1 %526 }
 0x32b   :  { %v559_v12 = vrot.slane %v527_v10, %v2486_v28 }
 0x32d   :  { %v566_v15 = vsel %vm424_vm9, %v559_v12, %v565_v14 }
 0x32e   :  { %v568_v16 = vsel %vm427_vm10, %v566_v15, 0.0 }
 0x32f   :  { %569 = vadd.xlane.f32.xlu1 %v568_v16 }
 0x3b8   :  { %v570_v19 = vpop.xlane.xlu1 %569 }
 0x3b9   :  { %v575_v20 = vrot.slane %v570_v19, %v2463_v36  ;;  %v579_v21 = vrot.slane %v570_v19, %v2505_v59  ;;  %v583_v23 = vrot.slane %v570_v19, %v2508_v60  ;;  %v587_v25 = vrot.slane %v570_v19, %v2473_v49 }
 0x3ba   :  { %v591_v26 = vrot.slane %v570_v19, %v450_v8  ;;  %v595_v31 = vrot.slane %v570_v19, %v454_v13  ;;  %v599_v38 = vrot.slane %v570_v19, %v458_v17  ;;  %v603_v8 = vrot.slane %v570_v19, %v462_v22 }
 0x3bb   :  { %2168 = vrcp.f32 %v575_v20  ;;  %v777_v20 = vld [vmem:[%s2817_s2 + $0x98] sm:$0xff] }
 0x3bc   :  { %2170 = vrcp.f32 %v579_v21 }
 0x3bd   :  { %2172 = vrcp.f32 %v583_v23  ;;  %v28_v23 = vld [vmem:[%s2816_s1 + $0x10] sm:$0xff] }
 0x3be   :  { %2174 = vrcp.f32 %v587_v25  ;;  %v776_v25 = vld [vmem:[%s2817_s2 + $0x90] sm:$0xff] }
 0x3bf   :  { %2176 = vrcp.f32 %v591_v26  ;;  %v774_v26 = vld [vmem:[%s2817_s2 + $0x80] sm:$0xff] }
 0x3c0   :  { %2178 = vrcp.f32 %v595_v31 }
 0x3c1   :  { %2180 = vrcp.f32 %v599_v38  ;;  %v781_v38 = vrot.slane %v2468_v37, %v2505_v59  ;;  %v2234_v59 = vmov 7  }
 0x3c2   :  { %2182 = vrcp.f32 %v603_v8 }
 0x3c8   :  { %v2169_v29 = vpop.eup %2168 }
 0x3c9   :  { %v613_v30 = vmul.f32 %v2169_v29, %v2153_v27  ;;  %v2171_v36 = vpop.eup %2170  ;;  %v923_v29 = vld [vmem:[%s2817_s2 + $0xf8] sm:$0xff] }
 0x3ca   :  { %v615_v33 = vmul.f32 %v2171_v36, %v2155_v32  ;;  %v2173_v34 = vpop.eup %2172 }
 0x3cb   :  { %637 = vperm.xlu0 %2127, %v613_v30   ;;  %v617_v49 = vmul.f32 %v2173_v34, %v2157_v39  ;;  %v2175_v47 = vpop.eup %2174  ;;  %v921_v30 = vld [vmem:[%s2817_s2 + $0xe8] sm:$0xff]  ;;  %v2230_v34 = vmov 2  }
 0x3cc   :  { %v619_v27 = vmul.f32 %v2175_v47, %v2159_v40  ;;  %v2177_v48 = vpop.eup %2176  ;;  %v2581_v40 = vld [vmem:[%s2817_s2 + $0xb8] sm:$0xff] }
 0x3cd   :  { %v621_v13 = vmul.f32 %v2177_v48, %v2526_v41  ;;  %v2179_v32 = vpop.eup %2178  ;;  %1977 = vmatpush3.msra.mxu0 %v2581_v40  ;;  %v2587_v41 = vld [vmem:[%s2817_s2 + $0xb0] sm:$0xff]  ;;  %v2233_v48 = vmov 5  }
 0x3ce   :  { %v623_v50 = vmul.f32 %v2179_v32, %v2529_v42  ;;  %v2181_v17 = vpop.eup %2180  ;;  %1978 = vmatprep.subr.mxu0 %v2227_v35  ;;  %v2601_v42 = vld [vmem:[%s2817_s2 + $0xa0] sm:$0xff] }
 0x3cf   :  { %640 = vperm.xlu0 %2127, %v615_v33   ;;  %v625_v39 = vmul.f32 %v2181_v17, %v2532_v45  ;;  %v2183_v51 = vpop.eup %2182  ;;  %1979 = vmatpush3.msra.mxu0 %v2587_v41  ;;  %v2229_v45 = vmov 1  }
 0x3d0   :  { %v627_v22 = vmul.f32 %v2183_v51, %v2535_v46  ;;  %1980 = vmatprep.subr.mxu0 %v2227_v35 }
 0x3d3   :  { %643 = vperm.xlu0 %2127, %v617_v49   ;;  %v2231_v49 = vmov 3  }
 0x3d7   :  { %646 = vperm.xlu0 %2127, %v619_v27   ;;  %v2232_v27 = vmov 4  }
 0x3db   :  { %649 = vperm.xlu0 %2127, %v621_v13  }
 0x3df   :  { %652 = vperm.xlu0 %2127, %v623_v50  }
 0x3e3   :  { %655 = vperm.xlu0 %2127, %v625_v39   ;;  %v2235_v39 = vmov 6  }
 0x3e7   :  { %658 = vperm.xlu0 %2127, %v627_v22  }
 0x3eb   :  { %912 = vrot.lane.b32.xlu0 %v2294_v7, %s2223_s9  ;;  %v2594_v7 = vld [vmem:[%s2817_s2 + $0xa8] sm:$0xff] }
 0x3ec   :  { %1981 = vmatpush3.msra.mxu0 %v2594_v7  ;;  %2129 = vset.pattern.permute.xlu0 %v2229_v45 }
 0x3ed   :  { %1982 = vmatprep.subr.mxu0 %v2227_v35 }
 0x3ee   :  { %1983 = vmatpush3.msra.mxu0 %v2601_v42 }
 0x3ef   :  { %1998 = vmatprep.subr.mxu0 %v2227_v35 }
 0x446   :  { %v638_v46 = vpop.permute.xlu0 %637 }
 0x447   :  { %v663_v61 = vrot.slane %v638_v46, %v2486_v28 }
 0x44a   :  { %v641_v52 = vpop.permute.xlu0 %640 }
 0x44b   :  { %v667_v57 = vrot.slane %v641_v52, %v2486_v28 }
 0x44d   :  { %v692_v4 = vsel %vm412_vm3, %v667_v57, %v663_v61 }
 0x44e   :  { %v644_v53 = vpop.permute.xlu0 %643 }
 0x44f   :  { %v671_v58 = vrot.slane %v644_v53, %v2486_v28 }
 0x451   :  { %v693_v9 = vsel %vm414_vm4, %v671_v58, %v692_v4 }
 0x452   :  { %v647_v54 = vpop.permute.xlu0 %646 }
 0x453   :  { %v675_v62 = vrot.slane %v647_v54, %v2486_v28 }
 0x455   :  { %v694_v11 = vsel %vm416_vm5, %v675_v62, %v693_v9 }
 0x456   :  { %v650_v55 = vpop.permute.xlu0 %649 }
 0x457   :  { %v679_v63 = vrot.slane %v650_v55, %v2486_v28 }
 0x459   :  { %v695_v12 = vsel %vm418_vm6, %v679_v63, %v694_v11 }
 0x45a   :  { %v653_v56 = vpop.permute.xlu0 %652 }
 0x45b   :  { %v683_v2 = vrot.slane %v653_v56, %v2486_v28 }
 0x45d   :  { %v696_v15 = vsel %vm420_vm7, %v683_v2, %v695_v12 }
 0x45e   :  { %v656_v3 = vpop.permute.xlu0 %655 }
 0x45f   :  { %v687_v10 = vrot.slane %v656_v3, %v2486_v28 }
 0x461   :  { %v697_v19 = vsel %vm422_vm8, %v687_v10, %v696_v15 }
 0x462   :  { %v659_v14 = vpop.permute.xlu0 %658 }
 0x463   :  { %v691_v16 = vrot.slane %v659_v14, %v2486_v28  ;;  %v775_v28 = vld [vmem:[%s2817_s2 + $0x88] sm:$0xff] }
 0x465   :  { %v698_v21 = vsel %vm424_vm9, %v691_v16, %v697_v19 }
 0x466   :  { %1911 = vmatpush3.xpose.msk.msra.mxu1 %vm427_vm10, %v698_v21  ;;  %v913_v31 = vpop.permute.xlu0 %912 }
 0x467   :  { %1915 = vmatprep.subr.mxu1 %v777_v20 }
 0x469   :  { %1913 = vmatmul.mubr.msk.f32.vlgmr.msra.gmra.mxu1 %vm427_vm10, %v28_v23 }
 0x46a   :  { %1916 = vmatpush3.msra.mxu1 %v777_v20  ;;  %1923 = vmatprep.mubr.msk.f32.mxu1 %vm174_vm0, %v2265_v0  ;;  %v922_v0 = vld [vmem:[%s2817_s2 + $0xf0] sm:$0xff] }
 0x46b   :  { %1917 = vmatprep.subr.mxu1 %v776_v25 }
 0x46c   :  { %1918 = vmatpush3.msra.mxu1 %v776_v25 }
 0x46d   :  { %1919 = vmatprep.subr.mxu1 %v775_v28 }
 0x46e   :  { %1920 = vmatpush3.msra.mxu1 %v775_v28 }
 0x46f   :  { %1921 = vmatprep.subr.mxu1 %v774_v26 }
 0x470   :  { %1922 = vmatpush3.msra.mxu1 %v774_v26 }
 0x471   :  { %1935 = vmatprep.subr.mxu1 %v2227_v35  ;;  %1924 = vmatmul.mubr.msk.f32.vlgmr.msra.gmra.mxu1 %vm174_vm0, %v2270_v1  ;;  %v920_v1 = vld [vmem:[%s2817_s2 + $0xe0] sm:$0xff] }
 0x472   :  { %1936 = vmatpush3.msra.mxu1 %v923_v29  ;;  %1926 = vmatprep.mubr.msk.f32.mxu1 %vm174_vm0, %v2284_v5  ;;  %v919_v5 = vld [vmem:[%s2817_s2 + $0xd8] sm:$0xff] }
 0x473   :  { %1937 = vmatprep.subr.mxu1 %v2227_v35 }
 0x474   :  { %1938 = vmatpush3.msra.mxu1 %v922_v0 }
 0x475   :  { %1939 = vmatprep.subr.mxu1 %v2227_v35  ;;  %1927 = vmatmul.mubr.msk.f32.gmra.mxu1 %vm174_vm0, %v2289_v6  ;;  %v918_v6 = vld [vmem:[%s2817_s2 + $0xd0] sm:$0xff] }
 0x476   :  { %1940 = vmatpush3.msra.mxu1 %v921_v30  ;;  %1929 = vmatprep.mubr.msk.f32.mxu1 %vm174_vm0, %v2313_v18  ;;  %v917_v18 = vld [vmem:[%s2817_s2 + $0xc8] sm:$0xff] }
 0x477   :  { %1941 = vmatprep.subr.mxu1 %v2227_v35 }
 0x478   :  { %1942 = vmatpush3.msra.mxu1 %v920_v1 }
 0x479   :  { %1943 = vmatprep.subr.mxu1 %v2227_v35  ;;  %1930 = vmatmul.mubr.msk.f32.gmra.mxu1 %vm174_vm0, %v2323_v24  ;;  %v916_v24 = vld [vmem:[%s2817_s2 + $0xc0] sm:$0xff] }
 0x47a   :  { %1944 = vmatpush3.msra.mxu1 %v919_v5  ;;  %1932 = vmatprep.mubr.msk.f32.mxu1 %vm174_vm0, %v2356_v43  ;;  %v2200_v43 = vld [vmem:[%s2816_s1 + $0x8] sm:$0xff] }
 0x47b   :  { %1945 = vmatprep.subr.mxu1 %v2227_v35  ;;  %v915_v36 = vsel %vm174_vm0, %v2200_v43, %v913_v31 }
 0x47c   :  { %1946 = vmatpush3.msra.mxu1 %v918_v6 }
 0x47d   :  { %1947 = vmatprep.subr.mxu1 %v2227_v35  ;;  %1933 = vmatmul.mubr.msk.f32.gmra.mxu1 %vm174_vm0, %v2361_v44 }
 0x47e   :  { %1948 = vmatpush3.msra.mxu1 %v917_v18  ;;  %1951 = vmatprep.mubr.msk.f32.mxu1 %vm2228_vm11, %v2227_v35 }
 0x47f   :  { %1949 = vmatprep.subr.mxu1 %v2227_v35 }
 0x480   :  { %1950 = vmatpush3.msra.mxu1 %v916_v24 }
 0x481   :  { %1954 = vmatprep.subr.mxu1 %v2227_v35  ;;  %1952 = vmatmul.mubr.msk.f32.vlgmr.msra.gmra.mxu1 %vm183_vm1, %v915_v36 }
 0x482   :  { %1955 = vmatpush3.msra.mxu1 %v2581_v40  ;;  %1962 = vmatprep.mubr.msk.f32.mxu1 %vm2228_vm11, %v2227_v35 }
 0x483   :  { %1956 = vmatprep.subr.mxu1 %v2227_v35 }
 0x484   :  { %1957 = vmatpush3.msra.mxu1 %v2587_v41 }
 0x485   :  { %1958 = vmatprep.subr.mxu1 %v2227_v35 }
 0x486   :  { %1959 = vmatpush3.msra.mxu1 %v2594_v7 }
 0x487   :  { %1960 = vmatprep.subr.mxu1 %v2227_v35 }
 0x488   :  { %1961 = vmatpush3.msra.mxu1 %v2601_v42 }
 0x489   :  { %1963 = vmatmul.mubr.f32.vlgmr.msra.gmra.mxu1 %v2227_v35  ;;  %1965 = vmatprep.subr.mxu1 %v2227_v35 }
 0x48a   :  { %1966 = vmatpush3.msra.mxu1 %v2581_v40  ;;  %1973 = vmatprep.mubr.msk.f32.mxu1 %vm2228_vm11, %v2227_v35 }
 0x48b   :  { %1967 = vmatprep.subr.mxu1 %v2227_v35 }
 0x48c   :  { %1968 = vmatpush3.msra.mxu1 %v2587_v41 }
 0x48d   :  { %1969 = vmatprep.subr.mxu1 %v2227_v35 }
 0x48e   :  { %1970 = vmatpush3.msra.mxu1 %v2594_v7 }
 0x48f   :  { %1971 = vmatprep.subr.mxu1 %v2227_v35 }
 0x490   :  { %1972 = vmatpush3.msra.mxu1 %v2601_v42 }
 0x491   :  { %1987 = vmatprep.subr.mxu1 %v2227_v35 }
 0x529   :  { %v770_v44 = vpop.f32.mrf.mxu1 }
 0x52a   :  { %1164 = vperm.xlu0 %2129, %v770_v44   ;;  %1082 = vperm.xlu1 %2128, %v770_v44  }
 0x52b   :  { %v1914_v33 = vpop.f32.mrf.mxu1 }
 0x52e   :  { %2130 = vset.pattern.permute.xlu0 %v2230_v34  ;;  %2131 = vset.pattern.permute.xlu1 %v2231_v49 }
 0x52f   :  { %1246 = vperm.xlu0 %2130, %v770_v44   ;;  %1328 = vperm.xlu1 %2131, %v770_v44  }
 0x531   :  { %v1925_v8 = vpop.f32.mrf.mxu1 }
 0x532   :  { %v878_v47 = vadd.f32 %v1925_v8, %v781_v38 }
 0x533   :  { %2132 = vset.pattern.permute.xlu0 %v2232_v27  ;;  %2133 = vset.pattern.permute.xlu1 %v2233_v48  ;;  %v872_v13 = vpop.f32.mrf.mxu1 }
 0x534   :  { %1410 = vperm.xlu0 %2132, %v770_v44   ;;  %1492 = vperm.xlu1 %2133, %v770_v44   ;;  %v873_v61 = vadd.f32 %v872_v13, %v781_v38 }
 0x535   :  { %v1928_v32 = vpop.f32.mrf.mxu1 }
 0x536   :  { %v2717_v50 = vadd.f32 %v1928_v32, %v781_v38 }
 0x537   :  { %v882_v17 = vpop.f32.mrf.mxu1 }
 0x538   :  { %2135 = vset.pattern.permute.xlu0 %v2234_v59  ;;  %2134 = vset.pattern.permute.xlu1 %v2235_v39  ;;  %v883_v51 = vadd.f32 %v882_v17, %v781_v38 }
 0x539   :  { %1656 = vperm.xlu0 %2135, %v770_v44   ;;  %1574 = vperm.xlu1 %2134, %v770_v44   ;;  %v1931_v22 = vpop.f32.mrf.mxu1 }
 0x53a   :  { %v2719_v45 = vadd.f32 %v1931_v22, %v781_v38 }
 0x53b   :  { %v892_v46 = vpop.f32.mrf.mxu1 }
 0x53c   :  { %v2721_v52 = vadd.f32 %v892_v46, %v781_v38 }
 0x53d   :  { %v1934_v53 = vpop.f32.mrf.mxu1 }
 0x53e   :  { %v2723_v54 = vadd.f32 %v1934_v53, %v781_v38  ;;  %v1664_v53 = vld [vmem:[%s2817_s2 + $0x118] sm:$0xff] }
 0x53f   :  { %v902_v55 = vpop.f32.mrf.mxu1 }
 0x540   :  { %v2725_v56 = vadd.f32 %v902_v55, %v781_v38  ;;  %v1663_v55 = vld [vmem:[%s2817_s2 + $0x110] sm:$0xff] }
 0x541   :  { %v2727_v57 = vpop.f32.mrf.mxu1 }
 0x543   :  { %v1953_v58 = vpop.f32.mrf.mxu1 }
 0x544   :  { %v1661_v58 = vld [vmem:[%s2817_s2 + $0x100] sm:$0xff] }
 0x549   :  { %v1074_v62 = vpop.f32.mrf.mxu1 }
 0x54a   :  { %v1078_v63 = vadd.f32 %v1074_v62, %v873_v61 }
 0x54b   :  { %v1964_v3 = vpop.f32.mrf.mxu1 }
 0x54c   :  { %2184 = vtanh.f32 %v1078_v63 }
 0x559   :  { %v2185_v4 = vpop.eup %2184 }
 0x5a5   :  { %v1083_v2 = vpop.permute.xlu1 %1082  ;;  %v1165_v16 = vpop.permute.xlu0 %1164 }
 0x5a6   :  { %v1085_v9 = vmul.f32 %v2185_v4, %v1083_v2 }
 0x5a8   :  { %1974 = vmatmul.mubr.msk.f32.vlgmr.msra.gmra.mxu1 %vm174_vm0, %v1085_v9 }
 0x5a9   :  { %1988 = vmatpush3.msra.mxu1 %v2581_v40  ;;  %1995 = vmatprep.mubr.msk.f32.mxu1 %vm2228_vm11, %v2227_v35 }
 0x5aa   :  { %1989 = vmatprep.subr.mxu1 %v2227_v35  ;;  %v1247_v29 = vpop.permute.xlu0 %1246  ;;  %v1329_v24 = vpop.permute.xlu1 %1328 }
 0x5ab   :  { %1990 = vmatpush3.msra.mxu1 %v2587_v41 }
 0x5ac   :  { %1991 = vmatprep.subr.mxu1 %v2227_v35 }
 0x5ad   :  { %1992 = vmatpush3.msra.mxu1 %v2594_v7 }
 0x5ae   :  { %1993 = vmatprep.subr.mxu1 %v2227_v35 }
 0x5af   :  { %1994 = vmatpush3.msra.mxu1 %v2601_v42  ;;  %v1411_v8 = vpop.permute.xlu0 %1410  ;;  %v1493_v17 = vpop.permute.xlu1 %1492 }
 0x5b0   :  { %2009 = vmatprep.subr.mxu1 %v2227_v35 }
 0x5b4   :  { %v1657_v2 = vpop.permute.xlu0 %1656 }
 0x668   :  { %v1156_v10 = vpop.f32.mrf.mxu1 }
 0x669   :  { %v1160_v11 = vadd.f32 %v1156_v10, %v878_v47 }
 0x66a   :  { %v1975_v12 = vpop.f32.mrf.mxu1 }
 0x66b   :  { %2186 = vtanh.f32 %v1160_v11  ;;  %v927_v11 = vrot.slane %v2468_v37, %v2508_v60 }
 0x66d   :  { %v998_v12 = vadd.f32 %v2727_v57, %v927_v11 }
 0x678   :  { %v2187_v14 = vpop.eup %2186 }
 0x679   :  { %v1162_v15 = vsub.f32 %v2187_v14, %v1085_v9 }
 0x67b   :  { %v1167_v19 = vmul.f32 %v1165_v16, %v1162_v15 }
 0x67d   :  { %v1168_v20 = vadd.f32 %v1167_v19, %v1085_v9 }
 0x67f   :  { %1985 = vmatmul.mubr.msk.f32.vlgmr.msra.gmra.mxu0 %vm174_vm0, %v1168_v20 }
 0x680   :  { %1999 = vmatpush3.msra.mxu0 %v2581_v40  ;;  %2006 = vmatprep.mubr.msk.f32.mxu0 %vm2228_vm11, %v2227_v35 }
 0x681   :  { %2000 = vmatprep.subr.mxu0 %v2227_v35 }
 0x682   :  { %2001 = vmatpush3.msra.mxu0 %v2587_v41 }
 0x683   :  { %2002 = vmatprep.subr.mxu0 %v2227_v35 }
 0x684   :  { %2003 = vmatpush3.msra.mxu0 %v2594_v7 }
 0x685   :  { %2004 = vmatprep.subr.mxu0 %v2227_v35 }
 0x686   :  { %2005 = vmatpush3.msra.mxu0 %v2601_v42 }
 0x687   :  { %2020 = vmatprep.subr.mxu0 %v2227_v35 }
 0x73f   :  { %v1238_v21 = vpop.f32.mrf.mxu0 }
 0x740   :  { %v1242_v23 = vadd.f32 %v1238_v21, %v883_v51 }
 0x741   :  { %v1986_v25 = vpop.f32.mrf.mxu0 }
 0x742   :  { %2188 = vtanh.f32 %v1242_v23 }
 0x74f   :  { %v2189_v28 = vpop.eup %2188 }
 0x750   :  { %v1244_v26 = vsub.f32 %v2189_v28, %v1168_v20 }
 0x752   :  { %v1249_v0 = vmul.f32 %v1247_v29, %v1244_v26 }
 0x754   :  { %v1250_v30 = vadd.f32 %v1249_v0, %v1168_v20 }
 0x756   :  { %1996 = vmatmul.mubr.msk.f32.vlgmr.msra.gmra.mxu1 %vm174_vm0, %v1250_v30 }
 0x757   :  { %2010 = vmatpush3.msra.mxu1 %v2581_v40  ;;  %2017 = vmatprep.mubr.msk.f32.mxu1 %vm2228_vm11, %v2227_v35 }
 0x758   :  { %2011 = vmatprep.subr.mxu1 %v2227_v35 }
 0x759   :  { %2012 = vmatpush3.msra.mxu1 %v2587_v41 }
 0x75a   :  { %2013 = vmatprep.subr.mxu1 %v2227_v35 }
 0x75b   :  { %2014 = vmatpush3.msra.mxu1 %v2594_v7 }
 0x75c   :  { %2015 = vmatprep.subr.mxu1 %v2227_v35 }
 0x75d   :  { %2016 = vmatpush3.msra.mxu1 %v2601_v42 }
 0x75e   :  { %2031 = vmatprep.subr.mxu1 %v2227_v35 }
 0x816   :  { %v1320_v1 = vpop.f32.mrf.mxu1 }
 0x817   :  { %v1324_v5 = vadd.f32 %v1320_v1, %v2717_v50 }
 0x818   :  { %v1997_v6 = vpop.f32.mrf.mxu1 }
 0x819   :  { %2190 = vtanh.f32 %v1324_v5 }
 0x826   :  { %v2191_v18 = vpop.eup %2190 }
 0x827   :  { %v1326_v31 = vsub.f32 %v2191_v18, %v1250_v30 }
 0x829   :  { %v1331_v43 = vmul.f32 %v1329_v24, %v1326_v31 }
 0x82b   :  { %v1332_v36 = vadd.f32 %v1331_v43, %v1250_v30 }
 0x82d   :  { %2007 = vmatmul.mubr.msk.f32.vlgmr.msra.gmra.mxu0 %vm174_vm0, %v1332_v36 }
 0x82e   :  { %2021 = vmatpush3.msra.mxu0 %v2581_v40  ;;  %2028 = vmatprep.mubr.msk.f32.mxu0 %vm2228_vm11, %v2227_v35 }
 0x82f   :  { %2022 = vmatprep.subr.mxu0 %v2227_v35 }
 0x830   :  { %2023 = vmatpush3.msra.mxu0 %v2587_v41 }
 0x831   :  { %2024 = vmatprep.subr.mxu0 %v2227_v35 }
 0x832   :  { %2025 = vmatpush3.msra.mxu0 %v2594_v7 }
 0x833   :  { %2026 = vmatprep.subr.mxu0 %v2227_v35 }
 0x834   :  { %2027 = vmatpush3.msra.mxu0 %v2601_v42 }
 0x835   :  { %2042 = vmatprep.subr.mxu0 %v2227_v35 }
 0x8ed   :  { %v1402_v44 = vpop.f32.mrf.mxu0 }
 0x8ee   :  { %v1406_v33 = vadd.f32 %v1402_v44, %v2721_v52 }
 0x8ef   :  { %v2008_v38 = vpop.f32.mrf.mxu0 }
 0x8f0   :  { %2192 = vtanh.f32 %v1406_v33 }
 0x8fd   :  { %v2193_v34 = vpop.eup %2192 }
 0x8fe   :  { %v1408_v49 = vsub.f32 %v2193_v34, %v1332_v36 }
 0x900   :  { %v1413_v47 = vmul.f32 %v1411_v8, %v1408_v49 }
 0x902   :  { %v1414_v27 = vadd.f32 %v1413_v47, %v1332_v36 }
 0x904   :  { %2018 = vmatmul.mubr.msk.f32.vlgmr.msra.gmra.mxu1 %vm174_vm0, %v1414_v27 }
 0x905   :  { %2032 = vmatpush3.msra.mxu1 %v2581_v40  ;;  %2039 = vmatprep.mubr.msk.f32.mxu1 %vm2228_vm11, %v2227_v35 }
 0x906   :  { %2033 = vmatprep.subr.mxu1 %v2227_v35 }
 0x907   :  { %2034 = vmatpush3.msra.mxu1 %v2587_v41 }
 0x908   :  { %2035 = vmatprep.subr.mxu1 %v2227_v35 }
 0x909   :  { %2036 = vmatpush3.msra.mxu1 %v2594_v7 }
 0x90a   :  { %2037 = vmatprep.subr.mxu1 %v2227_v35 }
 0x90b   :  { %2038 = vmatpush3.msra.mxu1 %v2601_v42 }
 0x9c4   :  { %v1484_v48 = vpop.f32.mrf.mxu1 }
 0x9c5   :  { %v1488_v13 = vadd.f32 %v1484_v48, %v2719_v45  ;;  %v1575_v45 = vpop.permute.xlu1 %1574 }
 0x9c6   :  { %v2019_v32 = vpop.f32.mrf.mxu1 }
 0x9c7   :  { %2194 = vtanh.f32 %v1488_v13 }
 0x9d4   :  { %v2195_v40 = vpop.eup %2194 }
 0x9d5   :  { %v1490_v50 = vsub.f32 %v2195_v40, %v1414_v27 }
 0x9d7   :  { %v1495_v59 = vmul.f32 %v1493_v17, %v1490_v50 }
 0x9d9   :  { %v1496_v39 = vadd.f32 %v1495_v59, %v1414_v27 }
 0x9db   :  { %2029 = vmatmul.mubr.msk.f32.vlgmr.msra.gmra.mxu0 %vm174_vm0, %v1496_v39 }
 0x9dc   :  { %2050 = vmatprep.mubr.msk.f32.mxu0 %vm2228_vm11, %v2227_v35  ;;  %2043 = vmatpush3.msra.mxu0 %v1664_v53 }
 0x9dd   :  { %2044 = vmatprep.subr.mxu0 %v2227_v35 }
 0x9de   :  { %2045 = vmatpush3.msra.mxu0 %v1663_v55 }
 0x9df   :  { %2046 = vmatprep.subr.mxu0 %v2227_v35 }
 0xa9b   :  { %v1566_v41 = vpop.f32.mrf.mxu0 }
 0xa9c   :  { %v1570_v7 = vadd.f32 %v1566_v41, %v2725_v56  ;;  %v1662_v56 = vld [vmem:[%s2817_s2 + $0x108] sm:$0xff]  ;;  %s2236_s2 = smov [#allocation2]  }
 0xa9d   :  { %v2030_v51 = vpop.f32.mrf.mxu0  ;;  %2047 = vmatpush3.msra.mxu0 %v1662_v56  ;;  %s1747_s6 = sshll.u32 %s2236_s2, 4  ;;  %s1748_s6 = int_to_ptr.vmem [resolvable:$true] %s1747_s6 }
 0xa9e   :  { %2196 = vtanh.f32 %v1570_v7  ;;  %2048 = vmatprep.subr.mxu0 %v2227_v35  ;;  %s2201_s7 = scalar_lea.vmem %s1748_s6, 128  ;;  %p2206_p1 = scmp.lt.s32.totalorder %s1748_s6, %s1748_s6 }
 0xa9f   :  { %2049 = vmatpush3.msra.mxu0 %v1661_v58  ;;  %p2202_p0 = scmp.ne.s32.totalorder %s1748_s6, %s2201_s7  ;;  %p2207_p2 = scmp.lt.s32.totalorder %s2201_s7, %s2201_s7 }
 0xaa1   :  { %p2208_p3 = por %p2207_p2, %p2206_p1 }
 0xaa3   :  { %p2209_p4 = pnand %p2208_p3, %p2202_p0 }
 0xaab   :  { %v2197_v42 = vpop.eup %2196 }
 0xaac   :  { %v1572_v22 = vsub.f32 %v2197_v42, %v1496_v39 }
 0xaae   :  { %v1577_v46 = vmul.f32 %v1575_v45, %v1572_v22 }
 0xab0   :  { %v1578_v52 = vadd.f32 %v1577_v46, %v1496_v39 }
 0xab2   :  { %2040 = vmatmul.mubr.msk.f32.vlgmr.msra.gmra.mxu1 %vm174_vm0, %v1578_v52 }
 0xb72   :  { %v1648_v61 = vpop.f32.mrf.mxu1 }
 0xb73   :  { %v1652_v62 = vadd.f32 %v1648_v61, %v2723_v54 }
 0xb74   :  { %v2041_v63 = vpop.f32.mrf.mxu1 }
 0xb75   :  { %2198 = vtanh.f32 %v1652_v62 }
 0xb82   :  { %v2199_v3 = vpop.eup %2198 }
 0xb83   :  { %v1654_v4 = vsub.f32 %v2199_v3, %v1578_v52 }
 0xb85   :  { %v1659_v9 = vmul.f32 %v1657_v2, %v1654_v4 }
 0xb87   :  { %v1660_v10 = vadd.f32 %v1659_v9, %v1578_v52 }
 0xb89   :  { %2051 = vmatmul.mubr.msk.f32.vlgmr.msra.gmra.mxu0 %vm174_vm0, %v1660_v10 }
 0xc49   :  { %v1734_v14 = vpop.f32.mrf.mxu0 }
 0xc4a   :  { %v1738_v35 = vadd.f32 %v1734_v14, %v998_v12 }
 0xc4b   :  { %v2052_v15 = vpop.f32.mrf.mxu0 }
 0xc4c   :  { %v1739_v54 = vmax.f32 %v1738_v35, 0.0 }
 0xc4e   :  { %1740 = vst.msk [vmem:[#allocation2] sm:$0xff] %vm174_vm0, %v1739_v54 }
 0xc4f   :  { %2212 = shalt.err (!%p2209_p4)
}
 0xc50   :  { %1750 = dma.vmem_to_hbm [thread:$0]  %s1748_s6, 128, %s2819_s4, [#allocation3]  }
 0xc51   :  { %2221 = dma.done.wait [#allocation3], 128  }
 0xc52   :  { %2222 = vsyncadd [#allocation3], 4294967168 }
 0xc53   :  { %1754 = vsyncpa [#allocation3], 1 }

</bundles_post_ra>
